<compile_context>
chip_gen: v7x
topology: tpu7x:2x2x1
jax: 0.10.0
libtpu: 0.0.40
codegen_flags: <defaults>
</compile_context>

<pallas_src>
import functools

import jax
import jax.numpy as jnp
from jax.experimental import pallas as pl
from jax.experimental.pallas import tpu as pltpu


def _round_up(x: int, m: int) -> int:
    return ((x + m - 1) // m) * m


def baseline_kernel(x_ref, w1_ref, b1_ref, w2_ref, b2_ref, o_ref, *, out_c: int):
    """lin1 -> relu -> (dropout=identity) -> lin2 -> relu -> masked softmax -> narrow store."""
    x = x_ref[...]                                                     # (TM, F_IN) bf16

    # lin1 on the MXU (bf16 operands, f32 accumulate); bias + relu on the VPU in f32.
    h = jnp.dot(x, w1_ref[...], preferred_element_type=jnp.float32) + b1_ref[...]
    h = jnp.maximum(h, 0.0)

    # dropout (p=DROPOUT) is identity at inference time.

    # lin2 on the MXU; bias + relu in f32.
    z = jnp.dot(h.astype(w2_ref.dtype), w2_ref[...],
                preferred_element_type=jnp.float32) + b2_ref[...]
    z = jnp.maximum(z, 0.0)

    # Mask padded logit lanes (>= out_c) before softmax (their exp underflows to exactly 0).
    lane = jax.lax.broadcasted_iota(jnp.int32, z.shape, dimension=1)
    z = jnp.where(lane < out_c, z, -1e30)

    # Numerically stable softmax over the lane-dense (128-wide) axis.
    z = z - jnp.max(z, axis=-1, keepdims=True)
    e = jnp.exp(z)
    inv = pl.reciprocal(jnp.sum(e, axis=-1, keepdims=True), approx=True)   # EUP slot
    p = e * inv

    # Narrow writeback: only the real out_c probability columns go to HBM.
    o_ref[...] = p[:, :out_c].astype(o_ref.dtype)


def prepare_baseline_params(w1, b1, w2, b2):
    """One-time (model-load) weight preparation, hoisted out of the per-call path.

    Pads hidden/out dims to 128 lanes (zero weights / zero bias) and casts the MXU
    operands to bf16; biases stay f32 for the VPU path.
    """
    f_in, hidden = w1.shape
    out_c = int(w2.shape[-1])
    hid_pad = _round_up(hidden, 128)
    out_pad = _round_up(max(out_c, 128), 128)

    w1p = jnp.zeros((f_in, hid_pad), jnp.bfloat16)
    w1p = w1p.at[:, :hidden].set(w1.astype(jnp.bfloat16))
    b1p = jnp.zeros((1, hid_pad), jnp.float32)
    b1p = b1p.at[:, :hidden].set(b1.reshape(1, hidden).astype(jnp.float32))

    w2p = jnp.zeros((hid_pad, out_pad), jnp.bfloat16)
    w2p = w2p.at[:hidden, :out_c].set(w2.astype(jnp.bfloat16))
    b2p = jnp.zeros((1, out_pad), jnp.float32)
    b2p = b2p.at[:, :out_c].set(b2.reshape(1, out_c).astype(jnp.float32))

    return {"w1": w1p, "b1": b1p, "w2": w2p, "b2": b2p, "out_c": out_c}


def baseline_forward(post_emb, params, *, tm_max: int = 1024):
    w1, b1, w2, b2 = params["w1"], params["b1"], params["w2"], params["b2"]
    out_c = params["out_c"]

    n = post_emb.shape[0]
    f_in = post_emb.shape[-1]
    hid_pad = w1.shape[1]
    out_pad = w2.shape[1]

    # Explicit squeeze of the size-1 dim (no jnp.squeeze N==1 hazard); bf16 for the MXU.
    x = post_emb.reshape(n, f_in).astype(jnp.bfloat16)

    # ---- Tile-size selection against an explicit VMEM budget ---------------------------
    resident = (f_in * hid_pad * 2          # w1 (bf16), VMEM-resident
                + hid_pad * out_pad * 2     # w2 (bf16), VMEM-resident
                + hid_pad * 4 + out_pad * 4)  # biases (f32)
    per_row = (2 * f_in * 2                 # x tile (bf16), double-buffered
               + 2 * out_c * 4              # output tile (f32), double-buffered
               + hid_pad * 4                # h intermediate (f32)
               + 2 * out_pad * 4)           # z / e intermediates (f32)
    vmem_budget = 40 << 20                  # headroom under v7x's 64 MiB; fine on v5e/v6e
    tm_budget = max(8, ((vmem_budget - resident) // per_row) // 8 * 8)
    tm_cap = max(8, min(tm_max, tm_budget))

    # Minimal batch padding + >=2 grid steps (so v7x megacore has work on both TCs and the
    # BlockSpec double-buffer has something to overlap with).
    n8 = _round_up(n, 8)
    min_steps = 2 if n8 >= 16 else 1
    steps = max(min_steps, pl.cdiv(n8, tm_cap))
    tm = _round_up(pl.cdiv(n8, steps), 8)
    n_pad = steps * tm
    if n_pad != n:
        x = jnp.pad(x, ((0, n_pad - n), (0, 0)))

    vmem_need = resident + tm * per_row
    vmem_limit = int(min(48 << 20, max(2 * vmem_need, 16 << 20)))

    kernel = functools.partial(baseline_kernel, out_c=out_c)

    bytes_accessed = (
        n_pad * f_in * 2                 # x (bf16)
        + f_in * hid_pad * 2             # w1 (bf16)
        + hid_pad * out_pad * 2          # w2 (bf16)
        + hid_pad * 4 + out_pad * 4      # biases (f32)
        + n_pad * out_c * 4              # output (f32, narrow)
    )

    out = pl.pallas_call(
        kernel,
        out_shape=jax.ShapeDtypeStruct((n_pad, out_c), jnp.float32),
        grid=(steps,),
        in_specs=[
            pl.BlockSpec((tm, f_in), lambda i: (i, 0)),        # x tile: pipelined
            pl.BlockSpec((f_in, hid_pad), lambda i: (0, 0)),   # weights: VMEM-resident
            pl.BlockSpec((1, hid_pad), lambda i: (0, 0)),
            pl.BlockSpec((hid_pad, out_pad), lambda i: (0, 0)),
            pl.BlockSpec((1, out_pad), lambda i: (0, 0)),
        ],
        out_specs=pl.BlockSpec((tm, out_c), lambda i: (i, 0)),  # narrow f32 store
        compiler_params=pltpu.CompilerParams(
            dimension_semantics=("parallel",),
            vmem_limit_bytes=vmem_limit,
        ),
        cost_estimate=pl.CostEstimate(
            flops=2 * n_pad * (f_in * hid_pad + hid_pad * out_pad),
            transcendentals=n_pad * out_pad,
            bytes_accessed=bytes_accessed,
        ),
    )(x, w1, b1, w2, b2)

    # Drop batch padding (logit lanes are already narrow).
    return out[:n, :]


def _reference_forward(post_emb, w1, b1, w2, b2):
    x = post_emb.reshape(post_emb.shape[0], post_emb.shape[-1]).astype(jnp.float32)
    h = jnp.maximum(x @ w1 + b1.reshape(1, -1), 0.0)
    z = jnp.maximum(h @ w2 + b2.reshape(1, -1), 0.0)
    return jax.nn.softmax(z, axis=-1)


if __name__ == "__main__":
    # Small shapes consistent with the module: batch of N answers, each a
    # (1, F_IN) post embedding -> reshape -> (N, F_IN).
    N, F_IN, HIDDEN, OUT = 16, 32, 32, 8

    key = jax.random.PRNGKey(0)
    k_x, k_w1, k_b1, k_w2, k_b2 = jax.random.split(key, 5)

    post_emb = jax.random.normal(k_x, (N, 1, F_IN), dtype=jnp.float32)

    # Deterministic parameter init (PyTorch Linear-style uniform bounds).
    bound1 = 1.0 / (F_IN ** 0.5)
    w1 = jax.random.uniform(k_w1, (F_IN, HIDDEN), jnp.float32, -bound1, bound1)
    b1 = jax.random.uniform(k_b1, (1, HIDDEN), jnp.float32, -bound1, bound1)
    bound2 = 1.0 / (HIDDEN ** 0.5)
    w2 = jax.random.uniform(k_w2, (HIDDEN, OUT), jnp.float32, -bound2, bound2)
    b2 = jax.random.uniform(k_b2, (1, OUT), jnp.float32, -bound2, bound2)

    # Model-load-time weight prep (hoisted out of the per-call path).
    params = prepare_baseline_params(w1, b1, w2, b2)

    out = baseline_forward(post_emb, params)
    out = jax.block_until_ready(out)

    # Sanity: shape, softmax rows sum to ~1, and agreement with an f32 reference
    # (loose tolerance: bf16 MXU operands + approx reciprocal are intentional tradeoffs).
    assert out.shape == (N, OUT)
    assert bool(jnp.allclose(jnp.sum(out, axis=-1), 1.0, atol=5e-3))
    ref = _reference_forward(post_emb, w1, b1, w2, b2)
    assert bool(jnp.allclose(out, ref, atol=5e-2))

    print("KERNEL_OK")
</pallas_src>

<mosaic_0001>
module attributes {stable_mosaic.version = 11 : i64} {
  func.func @baseline_kernel(%arg0: i32, %arg1: memref<8x32xbf16, #tpu.memory_space<vmem>>, %arg2: memref<32x128xbf16, #tpu.memory_space<vmem>>, %arg3: memref<1x128xf32, #tpu.memory_space<vmem>>, %arg4: memref<128x128xbf16, #tpu.memory_space<vmem>>, %arg5: memref<1x128xf32, #tpu.memory_space<vmem>>, %arg6: memref<8x8xf32, #tpu.memory_space<vmem>>) attributes {dimension_semantics = [#tpu.dimension_semantics<parallel>], iteration_bounds = array<i64: 2>, scalar_prefetch = 0 : i64, scratch_operands = 0 : i64, tpu.core_type = #tpu.core_type<tc>, window_params = [{transform_indices = @transform_0, window_bounds = array<i64: 8, 32>}, {pipeline_mode = #tpu.pipeline_mode<synchronous>, transform_indices = @transform_1, window_bounds = array<i64: 32, 128>}, {pipeline_mode = #tpu.pipeline_mode<synchronous>, transform_indices = @transform_2, window_bounds = array<i64: 1, 128>}, {pipeline_mode = #tpu.pipeline_mode<synchronous>, transform_indices = @transform_3, window_bounds = array<i64: 128, 128>}, {pipeline_mode = #tpu.pipeline_mode<synchronous>, transform_indices = @transform_4, window_bounds = array<i64: 1, 128>}, {transform_indices = @transform_5, window_bounds = array<i64: 8, 8>}]} {
    %c0 = arith.constant 0 : index
    %c0_0 = arith.constant 0 : index
    %0 = vector.load %arg1[%c0, %c0_0] : memref<8x32xbf16, #tpu.memory_space<vmem>>, vector<8x32xbf16>
    %c0_1 = arith.constant 0 : index
    %c0_2 = arith.constant 0 : index
    %1 = vector.load %arg2[%c0_1, %c0_2] : memref<32x128xbf16, #tpu.memory_space<vmem>>, vector<32x128xbf16>
    %cst = arith.constant dense<0.000000e+00> : vector<8x128xf32>
    %2 = tpu.matmul %0, %1, %cst {dimension_numbers = #tpu.dot_dimension_numbers<[1], [0], [0], [1], [0, 0, 1, 1], [], []>} : vector<8x32xbf16>, vector<32x128xbf16>, vector<8x128xf32> -> vector<8x128xf32>
    %c0_3 = arith.constant 0 : index
    %c0_4 = arith.constant 0 : index
    %3 = vector.load %arg3[%c0_3, %c0_4] : memref<1x128xf32, #tpu.memory_space<vmem>>, vector<1x128xf32>
    %4 = vector.broadcast %3 : vector<1x128xf32> to vector<8x128xf32>
    %5 = arith.addf %2, %4 : vector<8x128xf32>
    %cst_5 = arith.constant 0.000000e+00 : f32
    %6 = vector.broadcast %cst_5 : f32 to vector<8x128xf32>
    %7 = arith.maximumf %5, %6 : vector<8x128xf32>
    %8 = arith.truncf %7 : vector<8x128xf32> to vector<8x128xbf16>
    %c0_6 = arith.constant 0 : index
    %c0_7 = arith.constant 0 : index
    %9 = vector.load %arg4[%c0_6, %c0_7] : memref<128x128xbf16, #tpu.memory_space<vmem>>, vector<128x128xbf16>
    %cst_8 = arith.constant dense<0.000000e+00> : vector<8x128xf32>
    %10 = tpu.matmul %8, %9, %cst_8 {dimension_numbers = #tpu.dot_dimension_numbers<[1], [0], [0], [1], [0, 0, 1, 1], [], []>} : vector<8x128xbf16>, vector<128x128xbf16>, vector<8x128xf32> -> vector<8x128xf32>
    %c0_9 = arith.constant 0 : index
    %c0_10 = arith.constant 0 : index
    %11 = vector.load %arg5[%c0_9, %c0_10] : memref<1x128xf32, #tpu.memory_space<vmem>>, vector<1x128xf32>
    %12 = vector.broadcast %11 : vector<1x128xf32> to vector<8x128xf32>
    %13 = arith.addf %10, %12 : vector<8x128xf32>
    %cst_11 = arith.constant 0.000000e+00 : f32
    %14 = vector.broadcast %cst_11 : f32 to vector<8x128xf32>
    %15 = arith.maximumf %13, %14 : vector<8x128xf32>
    %16 = tpu.iota {dimensions = array<i32: 1>} : vector<8x128xi32>
    %c8_i32 = arith.constant 8 : i32
    %17 = vector.broadcast %c8_i32 : i32 to vector<8x128xi32>
    %18 = arith.cmpi slt, %16, %17 : vector<8x128xi32>
    %cst_12 = arith.constant -1.000000e+30 : f32
    %19 = vector.broadcast %cst_12 : f32 to vector<8x128xf32>
    %20 = arith.select %18, %15, %19 : vector<8x128xi1>, vector<8x128xf32>
    %cst_13 = arith.constant dense<0xFF800000> : vector<8xf32>
    %21 = vector.multi_reduction <maximumf>, %20, %cst_13 [1] : vector<8x128xf32> to vector<8xf32>
    %22 = vector.shape_cast %21 : vector<8xf32> to vector<8x1xf32>
    %23 = vector.broadcast %22 : vector<8x1xf32> to vector<8x128xf32>
    %24 = arith.subf %20, %23 : vector<8x128xf32>
    %25 = math.exp %24 : vector<8x128xf32>
    %cst_14 = arith.constant dense<0.000000e+00> : vector<8xf32>
    %26 = vector.multi_reduction <add>, %25, %cst_14 [1] : vector<8x128xf32> to vector<8xf32>
    %27 = vector.shape_cast %26 : vector<8xf32> to vector<8x1xf32>
    %28 = tpu.reciprocal %27 {approx = true} : vector<8x1xf32> -> vector<8x1xf32>
    %29 = vector.broadcast %28 : vector<8x1xf32> to vector<8x128xf32>
    %30 = arith.mulf %25, %29 : vector<8x128xf32>
    %31 = vector.extract_strided_slice %30 {offsets = [0, 0], sizes = [8, 8], strides = [1, 1]} : vector<8x128xf32> to vector<8x8xf32>
    %c0_15 = arith.constant 0 : index
    %c0_16 = arith.constant 0 : index
    %32 = vector.load %arg6[%c0_15, %c0_16] : memref<8x8xf32, #tpu.memory_space<vmem>>, vector<8x8xf32>
    tpu.vector_store %arg6[%c0_15, %c0_16], %31 {strides = array<i32>} : memref<8x8xf32, #tpu.memory_space<vmem>>, vector<8x8xf32>,
    return
  }
  func.func @transform_0(%arg0: i32) -> (i32, i32) {
    %c0_i32 = arith.constant 0 : i32
    %c0_i32_0 = arith.constant 0 : i32
    return %arg0, %c0_i32 : i32, i32
  }
  func.func @transform_1(%arg0: i32) -> (i32, i32) {
    %c0_i32 = arith.constant 0 : i32
    %c0_i32_0 = arith.constant 0 : i32
    %c0_i32_1 = arith.constant 0 : i32
    return %c0_i32, %c0_i32_0 : i32, i32
  }
  func.func @transform_2(%arg0: i32) -> (i32, i32) {
    %c0_i32 = arith.constant 0 : i32
    %c0_i32_0 = arith.constant 0 : i32
    %c0_i32_1 = arith.constant 0 : i32
    return %c0_i32, %c0_i32_0 : i32, i32
  }
  func.func @transform_3(%arg0: i32) -> (i32, i32) {
    %c0_i32 = arith.constant 0 : i32
    %c0_i32_0 = arith.constant 0 : i32
    %c0_i32_1 = arith.constant 0 : i32
    return %c0_i32, %c0_i32_0 : i32, i32
  }
  func.func @transform_4(%arg0: i32) -> (i32, i32) {
    %c0_i32 = arith.constant 0 : i32
    %c0_i32_0 = arith.constant 0 : i32
    %c0_i32_1 = arith.constant 0 : i32
    return %c0_i32, %c0_i32_0 : i32, i32
  }
  func.func @transform_5(%arg0: i32) -> (i32, i32) {
    %c0_i32 = arith.constant 0 : i32
    %c0_i32_0 = arith.constant 0 : i32
    return %arg0, %c0_i32 : i32, i32
  }
}

</mosaic_0001>

<bundles_post_ra>
// kernel: tpu_custom_call.1
= control target key start
LH: loop header
LB: loop body
LE: loop exit
PB: predicated region body
PF: predicated region fallthrough
CT: control target
= control target key end

     0   :  { %10 = vsyncpa [#allocation3], 0  ;;  %s1037_s0 = inlined_call_operand.hbm [shape: bf16[16,32], index: 0, kind: input, shape index: {}]   ;;  %s1038_s1 = inlined_call_operand.hbm [shape: bf16[32,128], index: 1, kind: input, shape index: {}]   ;;  %s1039_s2 = inlined_call_operand.vmem [shape: f32[1,128], index: 2, kind: input, shape index: {}]   ;;  %s1040_s3 = inlined_call_operand.hbm [shape: bf16[128,128], index: 3, kind: input, shape index: {}]   ;;  %s1041_s4 = inlined_call_operand.vmem [shape: f32[1,128], index: 4, kind: input, shape index: {}]   ;;  %s1042_s5 = inlined_call_operand.vmem [shape: f32[16,8], index: 5, kind: output, shape index: {}]  }
   0x1   :  { %12 = vsyncpa [#allocation3 + $0x1], 0 }
   0x2   :  { %13 = vsyncpa [#allocation5], 0  ;;  %s859_s18 = smov 0   ;;  %s861_s19 = smov 0  }
   0x3   :  { %s863_s20 = smov 0   ;;  %s865_s21 = smov 0  }
   0x4 LB: > { %s878_s22 = sadd.s32 4294967295, %s820_s21   ;;  %p39_p0 = scmp.ne.s32.totalorder %s812_s19, %s808_s18  ;;  %s820_s21 = sphi %s865_s21, %s1057_s21   ;;  %s816_s20 = sphi %s863_s20, %s1056_s20   ;;  %s812_s19 = sphi %s861_s19, %s1055_s19   ;;  %s808_s18 = sphi %s859_s18, %s1054_s18  }
   0x5   : > { %p1043_p1 = scmp.eq.s32.totalorder %s878_s22, 0  ;;  %p552_p2 = scmp.ge.s32.totalorder %s820_s21, 1 }
   0x6   : > { %p160_p3 = scmp.lt.s32.totalorder %s820_s21, 3  ;;  %s822_s25 = smov [#allocation4]  }
   0x7   : > { %p886_p4 = por %p1043_p1, %p39_p0  ;;  %s172_s26 = sshll.u32 %s822_s25, 4  ;;  %s173_s26 = int_to_ptr.vmem [resolvable:$true] %s172_s26 }
   0x8   : > { %p890_p5 = pnand %p552_p2, %p160_p3  ;;  %s823_s28 = smov [#allocation6]  }
   0x9   : > { %s1046_s23 = scalar_select %p886_p4, 1, 0 }
   0xa   : > { %s1047_s24 = scalar_select %p890_p5, 1, 0 }
   0xb   : > { %p628_p6 = pneg %p890_p5  ;;  %s188_s29 = sshll.u32 %s823_s28, 4  ;;  %s902_s29 = int_to_ptr.vmem [resolvable:$true] %s188_s29 }
   0xc   : > { %s696_s7 = scalar_lea.hbm %s1038_s1, 256 }
   0xd   : > { %p898_p7 = pnand %p628_p6, %p1043_p1  ;;  %p697_p8 = scmp.ne.s32.totalorder %s1038_s1, %s696_s7 }
   0xe   : > { %p703_p12 = scmp.lt.u32.totalorder %s696_s7, %s1038_s1 }
   0xf   : > { %p698_p9 = pneg %p898_p7 }
  0x11   : > { %p699_p10 = pnand %p698_p9, %p697_p8 }
  0x13   : > { %p700_p11 = pneg %p699_p10 }
  0x15   : > { %p705_p13 = pnand %p703_p12, %p700_p11 }
  0x17   : > { %708 = shalt.err (!%p705_p13)
}
  0x18   : > { %s709_s12 = scalar_lea.vmem %s173_s26, 256  ;;  %p717_p6 = scmp.lt.s32.totalorder %s173_s26, %s173_s26 }
  0x19   : > { %p710_p0 = scmp.ne.s32.totalorder %s173_s26, %s709_s12  ;;  %p718_p1 = scmp.lt.s32.totalorder %s709_s12, %s709_s12 }
  0x1b   : > { %p712_p2 = pnand %p710_p0, %p698_p9  ;;  %p719_p4 = por %p718_p1, %p717_p6 }
  0x1d   : > { %p713_p3 = pneg %p712_p2 }
  0x1f   : > { %p720_p5 = pnand %p719_p4, %p713_p3 }
  0x21   : > { %723 = shalt.err (!%p720_p5)
}
  0x22   : > { %s824_s13 = smov 64   ;;  %s825_s14 = smov 4  }
  0x23   : > { %631 = dma.hbm_to_vmem [thread:$0]  (!%p898_p7), %s1038_s1, 256, %s173_s26, [#allocation5], %s824_s13, %s824_s13, %s825_s14  }
  0x24   : > { %s724_s25 = scalar_lea.hbm %s1040_s3, 1024 }
  0x25   : > { %p725_p8 = scmp.ne.s32.totalorder %s1040_s3, %s724_s25  ;;  %p731_p5 = scmp.lt.u32.totalorder %s724_s25, %s1040_s3 }
  0x27   : > { %p727_p1 = pnand %p725_p8, %p698_p9 }
  0x29   : > { %p728_p4 = pneg %p727_p1 }
  0x2b   : > { %p733_p10 = pnand %p731_p5, %p728_p4 }
  0x2d   : > { %736 = shalt.err (!%p733_p10)
}
  0x2e   : > { %s737_s26 = scalar_lea.vmem %s902_s29, 1024  ;;  %p745_p0 = scmp.lt.s32.totalorder %s902_s29, %s902_s29 }
  0x2f   : > { %p738_p11 = scmp.ne.s32.totalorder %s902_s29, %s737_s26  ;;  %p746_p2 = scmp.lt.s32.totalorder %s737_s26, %s737_s26 }
  0x31   : > { %p740_p12 = pnand %p738_p11, %p698_p9  ;;  %p747_p3 = por %p746_p2, %p745_p0 }
  0x33   : > { %p741_p13 = pneg %p740_p12 }
  0x35   : > { %p748_p6 = pnand %p747_p3, %p741_p13 }
  0x37   : > { %751 = shalt.err (!%p748_p6)
}
  0x38   : > { %634 = dma.hbm_to_vmem [thread:$0]  (!%p898_p7), %s1040_s3, 1024, %s902_s29, [#allocation5], %s824_s13, %s824_s13, %s825_s14  }
  0x39   : > { %s952_s10 = sadd.s32 1, %s820_s21   ;;  %s26_s11 = sadd.s32 1, %s816_s20 }
  0x3a   : > { %s23_s27 = ssub.s32 %s820_s21, %s952_s10  ;;  %p33_p9 = scmp.ne.s32.totalorder %s816_s20, %s812_s19 }
  0x3b   : > { %p24_p8 = scmp.eq.s32.totalorder %s23_s27, 0  ;;  %p34_p1 = scmp.eq.s32.totalorder %s820_s21, 0 }
  0x3c   : > { %p641_p4 = scmp.lt.s32.totalorder %s820_s21, 2  ;;  %s205_s12 = sand.u32 1, %s816_s20  }
  0x3d   : > { %s963_s15 = scalar_select %p24_p8, %s816_s20, %s26_s11  }
  0x3e   : > { %p35_p5 = por %p34_p1, %p33_p9  ;;  %s556_s16 = sshll.u32 %s205_s12, 2 }
  0x3f   : > { %s557_s17 = sshll.u32 %s820_s21, 6  ;;  %s209_s29 = scalar_lea.vmem [#allocation2], %s556_s16 }
  0x40   : > { %s969_s28 = scalar_lea.hbm %s1037_s0, %s557_s17  ;;  %s216_s13 = sshll.u32 %s209_s29, 4  ;;  %s975_s13 = int_to_ptr.vmem [resolvable:$true] %s216_s13 }
  0x41   : > { %p971_p7 = pnand %p641_p4, %p35_p5  ;;  %s206_s21 = scalar_lea.sflag [#allocation3], %s205_s12 }
  0x42   : > { %s752_s30 = scalar_lea.hbm %s969_s28, 64  ;;  %s757_s26 = scalar_lea.hbm %s1037_s0, 128 }
  0x43   : > { %p753_p10 = scmp.ne.s32.totalorder %s969_s28, %s752_s30  ;;  %p754_p11 = pneg %p971_p7 }
  0x44   : > { %p758_p0 = scmp.lt.u32.totalorder %s969_s28, %s1037_s0  ;;  %p759_p2 = scmp.lt.u32.totalorder %s757_s26, %s752_s30 }
  0x45   : > { %p755_p12 = pnand %p754_p11, %p753_p10  ;;  %p761_p6 = scmp.lt.u32.totalorder %s752_s30, %s969_s28 }
  0x46   : > { %p760_p3 = por %p759_p2, %p758_p0 }
  0x47   : > { %p756_p13 = pneg %p755_p12 }
  0x48   : > { %p762_p9 = por %p761_p6, %p760_p3 }
  0x4a   : > { %p763_p8 = pnand %p762_p9, %p756_p13 }
  0x4c   : > { %766 = shalt.err (!%p763_p8)
}
  0x4d   : > { %s767_s11 = scalar_lea.vmem %s975_s13, 64  ;;  %s826_s27 = smov [#allocation2]  }
  0x4e   : > { %p768_p1 = scmp.ne.s32.totalorder %s975_s13, %s767_s11  ;;  %s772_s12 = sshll.u32 %s826_s27, 4  ;;  %s773_s12 = int_to_ptr.vmem [resolvable:$false] %s772_s12 }
  0x4f   : > { %s774_s16 = scalar_lea.vmem %s773_s12, 128  ;;  %p775_p10 = scmp.lt.s32.totalorder %s975_s13, %s773_s12 }
  0x50   : > { %p770_p4 = pnand %p768_p1, %p754_p11  ;;  %p776_p12 = scmp.lt.s32.totalorder %s774_s16, %s767_s11 }
  0x52   : > { %p771_p5 = pneg %p770_p4  ;;  %p777_p0 = por %p776_p12, %p775_p10 }
  0x54   : > { %p778_p2 = pnand %p777_p0, %p771_p5 }
  0x56   : > { %781 = shalt.err (!%p778_p2)
}
  0x57   : > { %638 = dma.hbm_to_vmem [thread:$0]  (!%p971_p7), %s969_s28, 64, %s975_s13, %s206_s21  }
  0x58   : > { %p1050_p13 = scmp.ne.s32.totalorder %s1047_s24, 0 }
  0x59   : > { %s227_s17 = sand.u32 (!%p1050_p13), 1, %s812_s19   ;;  %p1051_p11 = scmp.ne.s32.totalorder (!%p1050_p13), %s1046_s23, 0 }
  0x5a   : > { %225 = sbr.rel (%p1050_p13) target bundleno = 859 (0x35b), region = 40  ;;  %s559_s18 = sshll.u32 (!%p1050_p13), %s227_s17, 2 }
  0x5b   : > { %s228_s25 = scalar_lea.sflag (!%p1050_p13), [#allocation3], %s227_s17  ;;  %s231_s29 = scalar_lea.vmem (!%p1050_p13), [#allocation2], %s559_s18 }
  0x61   : > { %799 = dma.done.wait (%p1051_p11), %s228_s25, 64  }
  0x62   : > { %801 = vsyncadd (%p1051_p11), %s228_s25, 4294967232  ;;  %p1052_p3 = scmp.eq.s32.totalorder %s878_s22, 0 }
  0x64   : > { %803 = dma.done.wait (%p1052_p3), [#allocation5], 1280   ;;  %p1053_p6 = pmov %p1052_p3 }
  0x65   : > { %v827_v0 = vmov 0.0   ;;  %vm828_vm0 = vmmov 0   ;;  %v682_v1 = vld [vmem:[#allocation4] sm:$0xff]   ;;  %v683_v2 = vld [vmem:[#allocation4 + $0x8] sm:$0xff]   ;;  %v684_v3 = vld [vmem:[#allocation6] sm:$0xff]   ;;  %vm294_vm1 = vcmask 261120   ;;  %v452_v20 = vlaneseq }
  0x66   : > { %805 = vsyncadd (%p1053_p6), [#allocation5], 4294966016  ;;  %590 = vmatprep.subr.bf16.mxu0 %v827_v0  ;;  %594 = vmatprep.mubr.msk.bf16.mxu0 %vm828_vm0, %v827_v0  ;;  %v685_v4 = vld [vmem:[#allocation6 + $0x8] sm:$0xff]   ;;  %v686_v6 = vld [vmem:[#allocation6 + $0x10] sm:$0xff]   ;;  %p265_p7 = scmp.lt.s32.totalorder %s878_s22, 1  ;;  %vm465_vm3 = vcmask 64512  }
  0x67   : > { %598 = vmatprep.subr.bf16.mxu1 %v827_v0  ;;  %614 = vmatprep.mubr.msk.bf16.mxu1 %vm828_vm0, %v827_v0  ;;  %v270_v5 = vld [vmem:[%s231_s29] sm:$0xf]  ;;  %v687_v7 = vld [vmem:[#allocation6 + $0x18] sm:$0xff]   ;;  %v688_v8 = vld [vmem:[#allocation6 + $0x20] sm:$0xff]   ;;  %v453_v22 = vand.u32 127, %v452_v20 }
  0x68   : > { %591 = vmatpush3.bf16.msra.mxu0 %v682_v1  ;;  %599 = vmatpush3.bf16.msra.mxu1 %v684_v3  ;;  %v689_v9 = vld [vmem:[#allocation6 + $0x28] sm:$0xff]   ;;  %v690_v10 = vld [vmem:[#allocation6 + $0x30] sm:$0xff]   ;;  %v691_v11 = vld [vmem:[#allocation6 + $0x38] sm:$0xff]   ;;  %s1059_s22 = smov (!%p265_p7, %s878_s22), 1 }
  0x69   : > { %592 = vmatprep.subr.bf16.mxu0 %v827_v0  ;;  %600 = vmatprep.subr.bf16.mxu1 %v827_v0  ;;  %v563_v12 = vld [vmem:[%s1039_s2] ss:$0 sm:$0xff]  ;;  %vm454_vm2 = vcmp.lt.s32.totalorder %v453_v22, 8  ;;  %s562_s14 = sshll.u32 %s1059_s22, 3 }
  0x6a   : > { %v567_v21 = vld [vmem:[%s1041_s4] ss:$0 sm:$0xff]  ;;  %s268_s6 = scalar_lea.vmem %s1042_s5, %s562_s14 }
  0x6c   : > { %593 = vmatpush3.bf16.msra.mxu0 %v683_v2  ;;  %601 = vmatpush3.bf16.msra.mxu1 %v685_v4 }
  0x6d   : > { %602 = vmatprep.subr.bf16.mxu1 %v827_v0 }
  0x6f   : > { %595 = vmatmul.mubr.msk.bf16.vlgmr.msra.gmra.mrb[0].mxu0 %vm294_vm1, %v270_v5 }
  0x70   : > { %603 = vmatpush3.bf16.msra.mxu1 %v686_v6 }
  0x71   : > { %604 = vmatprep.subr.bf16.mxu1 %v827_v0 }
  0x74   : > { %605 = vmatpush3.bf16.msra.mxu1 %v687_v7 }
  0x75   : > { %606 = vmatprep.subr.bf16.mxu1 %v827_v0 }
  0x78   : > { %607 = vmatpush3.bf16.msra.mxu1 %v688_v8 }
  0x79   : > { %608 = vmatprep.subr.bf16.mxu1 %v827_v0 }
  0x7c   : > { %609 = vmatpush3.bf16.msra.mxu1 %v689_v9 }
  0x7d   : > { %610 = vmatprep.subr.bf16.mxu1 %v827_v0 }
  0x80   : > { %611 = vmatpush3.bf16.msra.mxu1 %v690_v10 }
  0x81   : > { %612 = vmatprep.subr.bf16.mxu1 %v827_v0 }
  0x84   : > { %613 = vmatpush3.bf16.msra.mxu1 %v691_v11 }
 0x142   : > { %v332_v13 = vpop.f32.mrb[0].mxu0 }
 0x143   : > { %v333_v14 = vadd.f32 %v563_v12, %v332_v13  ;;  %v596_v15 = vpop.f32.mrb[1].mxu0 }
 0x144   : > { %v335_v16 = vpop.f32.mrb[2].mxu0 }
 0x145   : > { %v338_v17 = vmax.f32 %v333_v14, 0.0  ;;  %v597_v18 = vpop.f32.mrb[3].mxu0 }
 0x147   : > { %v339_v19 = vpack.c.bf16 %v338_v17, %v338_v17 }
 0x149   : > { %615 = vmatmul.mubr.bf16.vlgmr.msra.gmra.mrb[0].mxu1 %v339_v19 }
 0x21c   : > { %v445_v23 = vpop.f32.mrb[0].mxu1 }
 0x21d   : > { %v446_v24 = vadd.f32 %v567_v21, %v445_v23  ;;  %v616_v25 = vpop.f32.mrb[1].mxu1 }
 0x21e   : > { %v448_v26 = vpop.f32.mrb[2].mxu1 }
 0x21f   : > { %v451_v27 = vmax.f32 %v446_v24, 0.0  ;;  %v617_v28 = vpop.f32.mrb[3].mxu1 }
 0x221   : > { %v455_v29 = vsel %vm454_vm2, %v451_v27, -1e+30 }
 0x222   : > { %456 = vmax.xlane.f32.xlu0 %v455_v29 }
 0x2af   : > { %v457_v30 = vpop.xlane.xlu0 %456 }
 0x2b0   : > { %v458_v31 = vsub.f32 %v455_v29, %v457_v30 }
 0x2b2   : > { %v459_v32 = vmul.f32 1.442695, %v458_v31 }
 0x2b4   : > { %692 = vpow2.f32 %v459_v32 }
 0x2be   : > { %v693_v33 = vpop.eup %692 }
 0x2bf   : > { %461 = vadd.xlane.f32.xlu0 %v693_v33 }
 0x34c   : > { %v462_v34 = vpop.xlane.xlu0 %461 }
 0x34d   : > { %694 = vrcp.f32 %v462_v34 }
 0x357   : > { %v695_v35 = vpop.eup %694 }
 0x358   : > { %v464_v36 = vmul.f32 %v695_v35, %v693_v33 }
 0x35a   : > { %466 = vst.msk [vmem:[%s268_s6] sm:$0xff] %vm465_vm3, %v464_v36 }
 0x35b PF: > { %p16_p9 = scmp.ge.s32.totalorder %s952_s10, 4   ;;  %s1054_s18 = smov %s812_s19 }
 0x35c   : > { %s1055_s19 = smov %s816_s20  ;;  %s1056_s20 = smov %s963_s15 }
 0x35d   : > { %s1057_s21 = smov %s952_s10  ;;  %18 = sbr.rel (!%p16_p9) target bundleno = 4 (0x4), region = 88 }
 0x364   :  { %486 = vsyncpa [#allocation3], 1 }
 0x365   :  { %488 = vsyncpa [#allocation3 + $0x1], 1 }
 0x366   :  { %489 = vsyncpa [#allocation5], 1 }

</bundles_post_ra>
